<compile_context>
chip_gen: v5e
topology: v5e:2x2
jax: 0.10.0
libtpu: 0.0.40
codegen_flags: <defaults>
</compile_context>

<pallas_src>
import functools

import jax
import jax.numpy as jnp
from jax.experimental import pallas as pl
from jax.experimental.pallas import tpu as pltpu


def _nll_loss_kernel(pred_ref, tgt_ref, out_ref, acc_ref, *, n_total):
    """Row-tiled mean NLL loss.

    pred_ref : (TILE_N, C) log-prob tile (upcast to f32 after load)
    tgt_ref  : (TILE_N, 1) int32 class indices
    out_ref  : (1, 1) f32 scalar result (SMEM)
    acc_ref  : (1, 1) f32 VMEM accumulator, resident across grid steps
    """
    i = pl.program_id(0)

    @pl.when(i == 0)
    def _init():
        acc_ref[...] = jnp.zeros_like(acc_ref)

    pred = pred_ref[...].astype(jnp.float32)   # single upcast right after load
    tgt = tgt_ref[...]                         # (TILE_N, 1) int32
    tn, c = pred.shape

    # One-hot gather of pred[i, target[i]] via iota + compare (no dynamic gather on TPU).
    col = jax.lax.broadcasted_iota(jnp.int32, (tn, c), 1)
    # Row-validity mask handles a padded remainder tile when TILE_N does not divide N.
    row = jax.lax.broadcasted_iota(jnp.int32, (tn, c), 0) + i * tn
    mask = (col == tgt) & (row < n_total)
    picked = jnp.where(mask, pred, jnp.zeros_like(pred))

    # Lane (class) reduce per row first, then sublane reduce; accumulate as (1, 1).
    partial = jnp.sum(jnp.sum(picked, axis=1, keepdims=True), axis=0, keepdims=True)
    acc_ref[...] += partial

    @pl.when(i == pl.num_programs(0) - 1)
    def _finalize():
        # Mean NLL: negate and scale by 1/N exactly once, in the epilogue.
        out_ref[0, 0] = acc_ref[0, 0] * jnp.float32(-1.0 / n_total)


def nll_loss(pred, target, trans_feat=None, *, tile_n=128):
    """Pallas equivalent of get_loss.forward(pred, target, trans_feat)."""
    del trans_feat  # the reference module ignores trans_feat entirely
    n, c = pred.shape

    # Pick a row tile: multiple of 8 (f32 sublane quantum) when possible,
    # otherwise fall back to a single full-extent block (always legal).
    if n % 8 == 0:
        tile = max(8, min((tile_n // 8) * 8, n))
    else:
        tile = n
    grid = (pl.cdiv(n, tile),)

    tgt2d = target.astype(jnp.int32).reshape(n, 1)

    kernel = functools.partial(_nll_loss_kernel, n_total=n)
    out = pl.pallas_call(
        kernel,
        out_shape=jax.ShapeDtypeStruct((1, 1), jnp.float32),
        grid=grid,
        in_specs=[
            pl.BlockSpec((tile, c), lambda i: (i, 0)),  # pred row-tile (pipelined)
            pl.BlockSpec((tile, 1), lambda i: (i, 0)),  # labels row-tile
        ],
        out_specs=pl.BlockSpec(memory_space=pltpu.MemorySpace.SMEM),
        scratch_shapes=[pltpu.VMEM((1, 1), jnp.float32)],
        compiler_params=pltpu.CompilerParams(
            dimension_semantics=("arbitrary",),  # grid axis is a reduction
        ),
    )(pred, tgt2d)
    return out[0, 0]


if __name__ == "__main__":
    key = jax.random.PRNGKey(0)
    k1, k2 = jax.random.split(key)

    N, C = 64, 32  # batch=64, num_classes=32
    logits = jax.random.normal(k1, (N, C), dtype=jnp.float32)
    pred = jax.nn.log_softmax(logits, axis=-1)  # F.nll_loss expects log-probs
    target = jax.random.randint(k2, (N,), 0, C, dtype=jnp.int32)
    trans_feat = jnp.zeros((N, 3, 3), dtype=jnp.float32)  # unused, as in the module

    loss = nll_loss(pred, target, trans_feat, tile_n=16)  # grid of 4 row-tiles
    loss = jax.block_until_ready(loss)

    # reference check in plain JAX
    ref = -jnp.mean(pred[jnp.arange(N), target])
    assert jnp.allclose(loss, ref, rtol=1e-5, atol=1e-5), (loss, ref)

    print("KERNEL_OK")
</pallas_src>

<mosaic_0001>
module attributes {stable_mosaic.version = 11 : i64} {
  func.func @_nll_loss_kernel(%arg0: i32, %arg1: memref<16x32xf32, #tpu.memory_space<vmem>>, %arg2: memref<16x1xi32, #tpu.memory_space<vmem>>, %arg3: memref<1x1xf32, #tpu.memory_space<smem>>, %arg4: memref<1x1xf32, #tpu.memory_space<vmem>>) attributes {dimension_semantics = [#tpu.dimension_semantics<arbitrary>], iteration_bounds = array<i64: 4>, scalar_prefetch = 0 : i64, scratch_operands = 1 : i64, tpu.core_type = #tpu.core_type<tc>, window_params = [{transform_indices = @transform_0, window_bounds = array<i64: 16, 32>}, {transform_indices = @transform_1, window_bounds = array<i64: 16, 1>}, {transform_indices = @transform_2, window_bounds = array<i64: 1, 1>}]} {
    %c0_i32 = arith.constant 0 : i32
    %0 = arith.cmpi eq, %arg0, %c0_i32 : i32
    %1 = arith.extui %0 : i1 to i32
    %c0_i32_0 = arith.constant 0 : i32
    %2 = arith.cmpi ne, %1, %c0_i32_0 : i32
    scf.if %2 {
      %cst_11 = arith.constant 0.000000e+00 : f32
      %27 = vector.broadcast %cst_11 : f32 to vector<1x1xf32>
      %c0_12 = arith.constant 0 : index
      %c0_13 = arith.constant 0 : index
      %28 = vector.load %arg4[%c0_12, %c0_13] : memref<1x1xf32, #tpu.memory_space<vmem>>, vector<1x1xf32>
      tpu.vector_store %arg4[%c0_12, %c0_13], %27 {strides = array<i32>} : memref<1x1xf32, #tpu.memory_space<vmem>>, vector<1x1xf32>,
    } else {
    }
    %c0 = arith.constant 0 : index
    %c0_1 = arith.constant 0 : index
    %3 = vector.load %arg1[%c0, %c0_1] : memref<16x32xf32, #tpu.memory_space<vmem>>, vector<16x32xf32>
    %c0_2 = arith.constant 0 : index
    %c0_3 = arith.constant 0 : index
    %4 = vector.load %arg2[%c0_2, %c0_3] : memref<16x1xi32, #tpu.memory_space<vmem>>, vector<16x1xi32>
    %5 = tpu.iota {dimensions = array<i32: 1>} : vector<16x32xi32>
    %6 = tpu.iota {dimensions = array<i32: 0>} : vector<16x32xi32>
    %c16_i32 = arith.constant 16 : i32
    %7 = arith.muli %arg0, %c16_i32 : i32
    %8 = vector.broadcast %7 : i32 to vector<16x32xi32>
    %9 = arith.addi %6, %8 : vector<16x32xi32>
    %10 = vector.broadcast %4 : vector<16x1xi32> to vector<16x32xi32>
    %11 = arith.cmpi eq, %5, %10 : vector<16x32xi32>
    %c64_i32 = arith.constant 64 : i32
    %12 = vector.broadcast %c64_i32 : i32 to vector<16x32xi32>
    %13 = arith.cmpi slt, %9, %12 : vector<16x32xi32>
    %14 = arith.andi %11, %13 : vector<16x32xi1>
    %cst = arith.constant 0.000000e+00 : f32
    %15 = vector.broadcast %cst : f32 to vector<16x32xf32>
    %16 = arith.select %14, %3, %15 : vector<16x32xi1>, vector<16x32xf32>
    %cst_4 = arith.constant dense<0.000000e+00> : vector<16xf32>
    %17 = vector.multi_reduction <add>, %16, %cst_4 [1] : vector<16x32xf32> to vector<16xf32>
    %18 = vector.shape_cast %17 : vector<16xf32> to vector<16x1xf32>
    %cst_5 = arith.constant dense<0.000000e+00> : vector<1xf32>
    %19 = vector.multi_reduction <add>, %18, %cst_5 [0] : vector<16x1xf32> to vector<1xf32>
    %20 = vector.shape_cast %19 : vector<1xf32> to vector<1x1xf32>
    %c0_6 = arith.constant 0 : index
    %c0_7 = arith.constant 0 : index
    %21 = vector.load %arg4[%c0_6, %c0_7] : memref<1x1xf32, #tpu.memory_space<vmem>>, vector<1x1xf32>
    %22 = arith.addf %21, %20 : vector<1x1xf32>
    %c0_8 = arith.constant 0 : index
    %c0_9 = arith.constant 0 : index
    %23 = vector.load %arg4[%c0_8, %c0_9] : memref<1x1xf32, #tpu.memory_space<vmem>>, vector<1x1xf32>
    tpu.vector_store %arg4[%c0_8, %c0_9], %22 {strides = array<i32>} : memref<1x1xf32, #tpu.memory_space<vmem>>, vector<1x1xf32>,
    %c3_i32 = arith.constant 3 : i32
    %24 = arith.cmpi eq, %arg0, %c3_i32 : i32
    %25 = arith.extui %24 : i1 to i32
    %c0_i32_10 = arith.constant 0 : i32
    %26 = arith.cmpi ne, %25, %c0_i32_10 : i32
    scf.if %26 {
      %c0_11 = arith.constant 0 : index
      %c0_12 = arith.constant 0 : index
      %27 = vector.load %arg4[%c0_11, %c0_12] : memref<1x1xf32, #tpu.memory_space<vmem>>, vector<1x1xf32>
      %28 = vector.extract %27[0, 0] : f32 from vector<1x1xf32>
      %cst_13 = arith.constant -1.562500e-02 : f32
      %29 = arith.mulf %28, %cst_13 : f32
      %c0_14 = arith.constant 0 : index
      %c0_15 = arith.constant 0 : index
      %30 = memref.load %arg3[%c0_14, %c0_15] : memref<1x1xf32, #tpu.memory_space<smem>>
      memref.store %29, %arg3[%c0_14, %c0_15] : memref<1x1xf32, #tpu.memory_space<smem>>
    } else {
    }
    return
  }
  func.func @transform_0(%arg0: i32) -> (i32, i32) {
    %c0_i32 = arith.constant 0 : i32
    %c0_i32_0 = arith.constant 0 : i32
    return %arg0, %c0_i32 : i32, i32
  }
  func.func @transform_1(%arg0: i32) -> (i32, i32) {
    %c0_i32 = arith.constant 0 : i32
    %c0_i32_0 = arith.constant 0 : i32
    return %arg0, %c0_i32 : i32, i32
  }
  func.func @transform_2(%arg0: i32) -> (i32, i32) {
    %c0_i32 = arith.constant 0 : i32
    %c0_i32_0 = arith.constant 0 : i32
    %c0_i32_1 = arith.constant 0 : i32
    return %c0_i32, %c0_i32_0 : i32, i32
  }
}

</mosaic_0001>

<bundles_post_ra>
// kernel: tpu_custom_call.1
= control target key start
LH: loop header
LB: loop body
LE: loop exit
PB: predicated region body
PF: predicated region fallthrough
CT: control target
= control target key end

     0   :  { %7 = vsyncpa [#allocation4], 0  ;;  %s352_s9 = smov 0   ;;  %s383_s0 = inlined_call_operand.vmem [shape: f32[64,32], index: 0, kind: input, shape index: {}]   ;;  %s384_s1 = inlined_call_operand.vmem [shape: s32[64,1], index: 1, kind: input, shape index: {}]   ;;  %s385_s2 = inlined_call_operand.hbm [shape: f32[1,1], index: 2, kind: output, shape index: {}]  }
   0x1 LB: > { %s358_s10 = sadd.s32 4294967295, %s332_s9   ;;  %p276_p0 = scmp.ge.s32.totalorder %s332_s9, 1  ;;  %s332_s9 = sphi %s352_s9, %s13_s9  }
   0x2   : > { %p120_p1 = scmp.lt.s32.totalorder %s332_s9, 5 }
   0x4   : > { %p121_p2 = pnand %p276_p0, %p120_p1 }
   0x5   : > { %s277_s11 = sshll.u32 (!%p121_p2), %s358_s10, 1  ;;  %p281_p4 = scmp.ne.s32.totalorder (!%p121_p2), %s358_s10, 0 }
   0x6   : > { %124 = sbr.rel (%p121_p2) target bundleno = 346 (0x15a), region = 28  ;;  %p143_p3 = scmp.lt.s32.totalorder (!%p121_p2), %s277_s11, 7 }
   0xb   : > { %s387_s11 = smov (!%p143_p3, %s277_s11), 7  ;;  %157 = sbr.rel (%p281_p4) target bundleno = 18 (0x12), region = 32 }
   0xc   : > { %s278_s12 = sshll.u32 %s387_s11, 3 }
   0xd   : > { %s366_s15 = scalar_lea.vmem %s383_s0, %s278_s12  ;;  %s152_s18 = scalar_lea.vmem %s384_s1, %s278_s12 }
  0x10   : > { %vm158_vm0 = vcmask 0   ;;  %v334_v0 = vmov 0.0  }
  0x11   : > { %159 = vst.msk [vmem:[#allocation2] sm:$0x1] %vm158_vm0, %v334_v0 }
  0x12 PF: > { %v162_v1 = vld [vmem:[%s152_s18] sm:$0xff]  ;;  %v335_v2 = vmov 0   ;;  %v163_v3 = vld [vmem:[%s152_s18 + $0x8] sm:$0xff]  ;;  %v164_v4 = vlaneseq  ;;  %s282_s19 = sshll.u32 %s358_s10, 4  ;;  %vm187_vm3 = vcmask 261120   ;;  %vm203_vm8 = vcmask 0  }
  0x13   : > { %307 = vset.pattern.permute.xlu0 %v335_v2  ;;  %v170_v6 = vstv %s282_s19  ;;  %v160_v11 = vld [vmem:[%s366_s15] sm:$0xff]  ;;  %v161_v16 = vld [vmem:[%s366_s15 + $0x8] sm:$0xff]  ;;  %p283_p5 = scmp.ne.s32.totalorder %s358_s10, 3 }
  0x14   : > { %174 = vperm.xlu0 %307, %v162_v1   ;;  %v167_v5 = vshrl.u32 %v164_v4, 7  ;;  %v165_v8 = vand.u32 127, %v164_v4 }
  0x16   : > { %v171_v7 = vadd.s32 %v170_v6, %v167_v5  ;;  %v168_v9 = vadd.s32 8, %v167_v5 }
  0x18   : > { %vm181_vm1 = vcmp.lt.s32.totalorder %v171_v7, 64  ;;  %v172_v13 = vadd.s32 %v170_v6, %v168_v9  ;;  %v201_v27 = vld [vmem:[#allocation2] sm:$0x1] }
  0x1a   : > { %vm182_vm5 = vcmp.lt.s32.totalorder %v172_v13, 64 }
  0x1c   : > { %177 = vperm.xlu0 %307, %v163_v3  }
  0x86   : > { %v175_v10 = vpop.permute.xlu0 %174 }
  0x87   : > { %vm179_vm2 = vcmp.eq.s32.totalorder %v165_v8, %v175_v10 }
  0x88   : > { %vm183_vm4 = vmand %vm179_vm2, %vm181_vm1 }
  0x89   : > { %v185_v12 = vsel %vm183_vm4, %v160_v11, 0.0 }
  0x8a   : > { %v188_v14 = vsel %vm187_vm3, %v185_v12, 0.0 }
  0x8b   : > { %189 = vadd.xlane.f32.xlu1 %v188_v14 }
  0x8e   : > { %v178_v15 = vpop.permute.xlu0 %177 }
  0x8f   : > { %vm180_vm6 = vcmp.eq.s32.totalorder %v165_v8, %v178_v15 }
  0x90   : > { %vm184_vm7 = vmand %vm180_vm6, %vm182_vm5 }
  0x91   : > { %v186_v17 = vsel %vm184_vm7, %v161_v16, 0.0 }
  0x92   : > { %v191_v18 = vsel %vm187_vm3, %v186_v17, 0.0 }
  0x93   : > { %192 = vadd.xlane.f32.xlu1 %v191_v18 }
  0xfe   : > { %v190_v19 = vpop.xlane.xlu1 %189 }
 0x106   : > { %v193_v20 = vpop.xlane.xlu1 %192 }
 0x107   : > { %v194_v21 = vadd.f32 %v193_v20, %v190_v19 }
 0x109   : > { %v195_v22 = vrot.slane %v194_v21, 4 }
 0x10b   : > { %v196_v23 = vadd.f32 %v195_v22, %v194_v21 }
 0x10d   : > { %v197_v24 = vrot.slane %v196_v23, 2 }
 0x10f   : > { %v198_v25 = vadd.f32 %v197_v24, %v196_v23 }
 0x111   : > { %v199_v26 = vrot.slane %v198_v25, 1 }
 0x113   : > { %v200_v28 = vadd.f32 %v199_v26, %v198_v25  ;;  %208 = sbr.rel (%p283_p5) target bundleno = 340 (0x154), region = 36 }
 0x115   : > { %v202_v29 = vadd.f32 %v201_v27, %v200_v28 }
 0x117   : > { %204 = vst.msk [vmem:[#allocation2] sm:$0x1] %vm203_vm8, %v202_v29 }
 0x11e   : > { %v209_v30 = vld [vmem:[#allocation2] sm:$0x1] }
 0x11f   : > { %288 = vpush %v209_v30 }
 0x150   : > { %s289_s20 = spop %288 }
 0x151   : > { %s211_s21 = smul.f32 -0.015625, %s289_s20 }
 0x153   : > { %213 = sst [smem:[#allocation3]] %s211_s21 }
 0x154 PF: > { %p294_p6 = scmp.eq.s32.totalorder %s358_s10, 3  ;;  %s220_s24 = sshll.u32 %s385_s2, 4  ;;  %s221_s24 = int_to_ptr.hbm [resolvable:$true] %s220_s24 }
 0x155   : > { %s336_s25 = smov [#allocation3]  }
 0x156   : > { %291 = dma.smem_to_hbm (%p294_p6), %s336_s25, 16, %s221_s24, [#allocation4]  }
 0x157   : > { %327 = dma.done.wait (%p294_p6), [#allocation4], 16  }
 0x158   : > { %329 = vsyncadd (%p294_p6), [#allocation4], 4294967280 }
 0x159   : > { %229 = sfence }
 0x15a PF: > { %s13_s9 = sadd.s32 1, %s332_s9  }
 0x15b   : > { %p10_p7 = scmp.ge.s32.totalorder %s13_s9, 6  }
 0x15d   :  { %12 = sbr.rel (!%p10_p7) target bundleno = 1 (0x1), region = 67 }
 0x162   :  { %235 = vsyncpa [#allocation4], 1 }
 0x163   :  { %237 = vsyncpa [#allocation4 + $0x1], 1 }

</bundles_post_ra>
